<compile_context>
chip_gen: v7x
topology: tpu7x:2x2x1
jax: 0.10.0
libtpu: 0.0.40
codegen_flags: <defaults>
</compile_context>

<pallas_src>
import math

import jax
import jax.numpy as jnp
from jax.experimental import pallas as pl
from jax.experimental.pallas import tpu as pltpu


def _pick_time_chunk(T, max_chunk=256):
    """Largest time-chunk <= max_chunk that divides T (no ragged last chunk)."""
    if T <= max_chunk:
        return T
    for tc in range(max_chunk, 0, -1):
        if T % tc == 0:
            return tc
    return T


def _pick_batch_chunk(B):
    """Split the batch across the two v7x TensorCores only when each half
    keeps (8, *) sublane alignment; otherwise keep the full batch per block."""
    if B % 16 == 0:
        return B // 2
    return B


def lstm_kernel(gx_ref, whh_ref, h0_ref, c0_ref, out_ref, hn_ref, cn_ref,
                h_sc, c_sc):
    """One (batch-block, time-chunk) grid step of the LSTM recurrence.

    gx_ref : (Tc, Bb, 4H)  precomputed x @ W_ih^T + bias (g-columns pre-scaled x2)
    whh_ref: (H, 4H)       W_hh^T (g-columns pre-scaled x2)
    h0/c0  : (Bb, H)       initial state for this batch block
    out    : (Tc, Bb, H)   per-step hidden states for this chunk
    hn/cn  : (Bb, H)       final state (written once, at the last time chunk)
    h_sc/c_sc : VMEM (Bb, H) f32 — state carried across time chunks.
    """
    t_idx = pl.program_id(1)
    n_t = pl.num_programs(1)
    Tc = gx_ref.shape[0]
    H = h0_ref.shape[-1]

    # New batch block starts at time chunk 0: (re)initialize the carried state.
    @pl.when(t_idx == 0)
    def _():
        h_sc[...] = h0_ref[...].astype(jnp.float32)
        c_sc[...] = c0_ref[...].astype(jnp.float32)

    # Loop-invariant recurrent weight: load once per grid step.
    whh = whh_ref[...]

    def step(t, carry):
        h, c = carry
        # gates = gates_x[t] + h @ W_hh^T  -> (Bb, 4H); one MXU push per step.
        gates = gx_ref[t] + jnp.dot(h, whh, preferred_element_type=jnp.float32)

        # Single EUP dispatch over the full (Bb, 4H) vreg.  PyTorch gate order
        # is i, f, g, o; the g columns were pre-scaled by 2 in the wrapper so
        # tanh(g_pre) == 2 * sigmoid(2 * g_pre) - 1.
        sg = jax.nn.sigmoid(gates)
        i_g = sg[:, 0 * H:1 * H]
        f_g = sg[:, 1 * H:2 * H]
        g_g = 2.0 * sg[:, 2 * H:3 * H] - 1.0
        o_g = sg[:, 3 * H:4 * H]

        c_new = f_g * c + i_g * g_g
        h_new = o_g * jnp.tanh(c_new)

        out_ref[t] = h_new.astype(out_ref.dtype)
        return (h_new, c_new)

    h_in = h_sc[...]
    c_in = c_sc[...]

    # Full unroll for short chunks, partial unroll otherwise (keeps the loop
    # body visible to the LLO scheduler; avoids rolled-scf.for penalty).
    unroll = Tc if Tc <= 32 else 8
    h_fin, c_fin = jax.lax.fori_loop(0, Tc, step, (h_in, c_in), unroll=unroll)

    # Carry the state into the next time chunk.
    h_sc[...] = h_fin
    c_sc[...] = c_fin

    # Final state is written exactly once.
    @pl.when(t_idx == n_t - 1)
    def _():
        hn_ref[...] = h_fin.astype(hn_ref.dtype)
        cn_ref[...] = c_fin.astype(cn_ref.dtype)


def encoder_forward(x, hidden, w_ih, w_hh, b_ih, b_hh):
    """Pallas implementation of Encoder.forward(x, hidden).

    x:      (T, B, D) float32
    hidden: (h0, c0) each (1, B, H)
    Returns (output, (h_n, c_n)) matching torch.nn.LSTM semantics.
    Note: lstm.flatten_parameters() is a CUDA-only memory-layout hint (no-op here).
    """
    h0, c0 = hidden
    T, B, D = x.shape
    H = h0.shape[-1]

    # Pre-scale the g-gate (third quarter) columns by 2 so the kernel can apply
    # one sigmoid to all four gates and recover tanh(g) = 2*sigmoid(2g) - 1.
    gate_scale = jnp.concatenate(
        [jnp.ones((2 * H,), jnp.float32),
         jnp.full((H,), 2.0, jnp.float32),
         jnp.ones((H,), jnp.float32)])                       # (4H,)

    wih_t = jnp.asarray(w_ih).T.astype(jnp.float32) * gate_scale   # (D, 4H)
    whh_t = jnp.asarray(w_hh).T.astype(jnp.float32) * gate_scale   # (H, 4H)
    b = (jnp.asarray(b_ih) + jnp.asarray(b_hh)).astype(jnp.float32) * gate_scale

    # Precompute the non-recurrent input projection for all timesteps as one
    # large batched matmul (off the serial critical path), fold the bias in.
    gates_x = jnp.einsum(
        "tbd,dg->tbg", x.astype(jnp.float32), wih_t,
        preferred_element_type=jnp.float32,
    ) + b                                                     # (T, B, 4H)

    h0_2d = h0.reshape(B, H).astype(jnp.float32)
    c0_2d = c0.reshape(B, H).astype(jnp.float32)

    Tc = _pick_time_chunk(T)          # divides T -> no ragged last chunk
    Bb = _pick_batch_chunk(B)
    n_b = B // Bb
    n_t = T // Tc

    out, hn, cn = pl.pallas_call(
        lstm_kernel,
        out_shape=(
            jax.ShapeDtypeStruct((T, B, H), x.dtype),         # output
            jax.ShapeDtypeStruct((B, H), x.dtype),            # h_n
            jax.ShapeDtypeStruct((B, H), x.dtype),            # c_n
        ),
        grid_spec=pltpu.PrefetchScalarGridSpec(
            num_scalar_prefetch=0,
            grid=(n_b, n_t),                                  # (batch-blocks, time-chunks)
            in_specs=[
                pl.BlockSpec((Tc, Bb, 4 * H), lambda b, t: (t, b, 0)),  # gates_x chunk
                pl.BlockSpec((H, 4 * H), lambda b, t: (0, 0)),          # W_hh^T
                pl.BlockSpec((Bb, H), lambda b, t: (b, 0)),             # h0 block
                pl.BlockSpec((Bb, H), lambda b, t: (b, 0)),             # c0 block
            ],
            out_specs=(
                pl.BlockSpec((Tc, Bb, H), lambda b, t: (t, b, 0)),      # output chunk
                pl.BlockSpec((Bb, H), lambda b, t: (b, 0)),             # h_n (resident over t)
                pl.BlockSpec((Bb, H), lambda b, t: (b, 0)),             # c_n (resident over t)
            ),
            scratch_shapes=[
                pltpu.VMEM((Bb, H), jnp.float32),             # h carried across chunks
                pltpu.VMEM((Bb, H), jnp.float32),             # c carried across chunks
            ],
        ),
        compiler_params=pltpu.CompilerParams(
            # batch blocks independent (megacore-shardable); time is a carried
            # recurrence -> arbitrary.
            dimension_semantics=("parallel", "arbitrary"),
            vmem_limit_bytes=32 * 1024 * 1024,                # safe on v5e/v6e/v7x
        ),
    )(gates_x, whh_t, h0_2d, c0_2d)

    return out, (hn[None], cn[None])


def lstm_reference(x, hidden, w_ih, w_hh, b_ih, b_hh):
    """Pure-JAX reference (matches torch.nn.LSTM single layer, fp32)."""
    h0, c0 = hidden
    H = h0.shape[-1]
    h = h0.reshape(-1, H)
    c = c0.reshape(-1, H)

    def step(carry, x_t):
        h, c = carry
        gates = x_t @ w_ih.T + h @ w_hh.T + b_ih + b_hh
        i = jax.nn.sigmoid(gates[:, 0 * H:1 * H])
        f = jax.nn.sigmoid(gates[:, 1 * H:2 * H])
        g = jnp.tanh(gates[:, 2 * H:3 * H])
        o = jax.nn.sigmoid(gates[:, 3 * H:4 * H])
        c_new = f * c + i * g
        h_new = o * jnp.tanh(c_new)
        return (h_new, c_new), h_new

    (h_n, c_n), out = jax.lax.scan(step, (h, c), x)
    return out, (h_n[None], c_n[None])


if __name__ == "__main__":
    # Small shapes consistent with Encoder(input_dim, hidden_dim)
    T, B, D, H = 8, 2, 4, 32
    std = 1.0 / math.sqrt(H)

    key = jax.random.PRNGKey(0)
    kx, kwi, kwh, kbi, kbh, khx, kcx = jax.random.split(key, 7)

    x = jax.random.normal(kx, (T, B, D), dtype=jnp.float32)

    # nn.LSTM parameters (PyTorch default init: U(-1/sqrt(H), 1/sqrt(H)))
    w_ih = jax.random.uniform(kwi, (4 * H, D), minval=-std, maxval=std)
    w_hh = jax.random.uniform(kwh, (4 * H, H), minval=-std, maxval=std)
    b_ih = jax.random.uniform(kbi, (4 * H,), minval=-std, maxval=std)
    b_hh = jax.random.uniform(kbh, (4 * H,), minval=-std, maxval=std)

    # Encoder.init_hidden: trainable (H,) vectors, U(-std, std), broadcast
    # to (1, B, H) as done when feeding nn.LSTM.
    init_hx = jax.random.uniform(khx, (H,), minval=-std, maxval=std)
    init_cx = jax.random.uniform(kcx, (H,), minval=-std, maxval=std)
    h0 = jnp.broadcast_to(init_hx, (1, B, H)).astype(jnp.float32)
    c0 = jnp.broadcast_to(init_cx, (1, B, H)).astype(jnp.float32)

    out, (h_n, c_n) = encoder_forward(x, (h0, c0), w_ih, w_hh, b_ih, b_hh)
    jax.block_until_ready((out, h_n, c_n))

    out_ref, (h_ref, c_ref) = lstm_reference(x, (h0, c0), w_ih, w_hh, b_ih, b_hh)

    assert out.shape == (T, B, H)
    assert h_n.shape == (1, B, H) and c_n.shape == (1, B, H)
    # tanh-via-sigmoid rewrite differs from jnp.tanh by a few f32 ulps per step.
    assert jnp.allclose(out, out_ref, atol=1e-4, rtol=1e-4)
    assert jnp.allclose(h_n, h_ref, atol=1e-4, rtol=1e-4)
    assert jnp.allclose(c_n, c_ref, atol=1e-4, rtol=1e-4)

    print("KERNEL_OK")
</pallas_src>

<mosaic_0001>
module attributes {stable_mosaic.version = 11 : i64} {
  func.func @lstm_kernel(%arg0: i32, %arg1: i32, %arg2: memref<8x2x128xf32, #tpu.memory_space<vmem>>, %arg3: memref<32x128xf32, #tpu.memory_space<vmem>>, %arg4: memref<2x32xf32, #tpu.memory_space<vmem>>, %arg5: memref<2x32xf32, #tpu.memory_space<vmem>>, %arg6: memref<8x2x32xf32, #tpu.memory_space<vmem>>, %arg7: memref<2x32xf32, #tpu.memory_space<vmem>>, %arg8: memref<2x32xf32, #tpu.memory_space<vmem>>, %arg9: memref<2x32xf32, #tpu.memory_space<vmem>>, %arg10: memref<2x32xf32, #tpu.memory_space<vmem>>) attributes {dimension_semantics = [#tpu.dimension_semantics<parallel>, #tpu.dimension_semantics<arbitrary>], iteration_bounds = array<i64: 1, 1>, scalar_prefetch = 0 : i64, scratch_operands = 2 : i64, tpu.core_type = #tpu.core_type<tc>, window_params = [{transform_indices = @transform_0, window_bounds = array<i64: 8, 2, 128>}, {pipeline_mode = #tpu.pipeline_mode<synchronous>, transform_indices = @transform_1, window_bounds = array<i64: 32, 128>}, {transform_indices = @transform_2, window_bounds = array<i64: 2, 32>}, {transform_indices = @transform_3, window_bounds = array<i64: 2, 32>}, {transform_indices = @transform_4, window_bounds = array<i64: 8, 2, 32>}, {transform_indices = @transform_5, window_bounds = array<i64: 2, 32>}, {transform_indices = @transform_6, window_bounds = array<i64: 2, 32>}]} {
    %c0_i32 = arith.constant 0 : i32
    %0 = arith.cmpi eq, %arg1, %c0_i32 : i32
    %1 = arith.extui %0 : i1 to i32
    %c0_i32_0 = arith.constant 0 : i32
    %2 = arith.cmpi ne, %1, %c0_i32_0 : i32
    scf.if %2 {
      %c0_76 = arith.constant 0 : index
      %c0_77 = arith.constant 0 : index
      %227 = vector.load %arg4[%c0_76, %c0_77] : memref<2x32xf32, #tpu.memory_space<vmem>>, vector<2x32xf32>
      %c0_78 = arith.constant 0 : index
      %c0_79 = arith.constant 0 : index
      %228 = vector.load %arg9[%c0_78, %c0_79] : memref<2x32xf32, #tpu.memory_space<vmem>>, vector<2x32xf32>
      tpu.vector_store %arg9[%c0_78, %c0_79], %227 {strides = array<i32>} : memref<2x32xf32, #tpu.memory_space<vmem>>, vector<2x32xf32>,
      %c0_80 = arith.constant 0 : index
      %c0_81 = arith.constant 0 : index
      %229 = vector.load %arg5[%c0_80, %c0_81] : memref<2x32xf32, #tpu.memory_space<vmem>>, vector<2x32xf32>
      %c0_82 = arith.constant 0 : index
      %c0_83 = arith.constant 0 : index
      %230 = vector.load %arg10[%c0_82, %c0_83] : memref<2x32xf32, #tpu.memory_space<vmem>>, vector<2x32xf32>
      tpu.vector_store %arg10[%c0_82, %c0_83], %229 {strides = array<i32>} : memref<2x32xf32, #tpu.memory_space<vmem>>, vector<2x32xf32>,
    } else {
    }
    %c0 = arith.constant 0 : index
    %c0_1 = arith.constant 0 : index
    %3 = vector.load %arg3[%c0, %c0_1] : memref<32x128xf32, #tpu.memory_space<vmem>>, vector<32x128xf32>
    %c0_2 = arith.constant 0 : index
    %c0_3 = arith.constant 0 : index
    %4 = vector.load %arg9[%c0_2, %c0_3] : memref<2x32xf32, #tpu.memory_space<vmem>>, vector<2x32xf32>
    %c0_4 = arith.constant 0 : index
    %c0_5 = arith.constant 0 : index
    %5 = vector.load %arg10[%c0_4, %c0_5] : memref<2x32xf32, #tpu.memory_space<vmem>>, vector<2x32xf32>
    %c0_i32_6 = arith.constant 0 : i32
    %6 = arith.index_cast %c0_i32_6 : i32 to index
    %c0_7 = arith.constant 0 : index
    %c0_8 = arith.constant 0 : index
    %7 = vector.load %arg2[%6, %c0_7, %c0_8] : memref<8x2x128xf32, #tpu.memory_space<vmem>>, vector<1x2x128xf32>
    %8 = vector.shape_cast %7 : vector<1x2x128xf32> to vector<2x128xf32>
    %cst = arith.constant dense<0.000000e+00> : vector<2x128xf32>
    %9 = tpu.matmul %4, %3, %cst {dimension_numbers = #tpu.dot_dimension_numbers<[1], [0], [0], [1], [0, 0, 1, 1], [], []>} : vector<2x32xf32>, vector<32x128xf32>, vector<2x128xf32> -> vector<2x128xf32>
    %10 = arith.addf %8, %9 : vector<2x128xf32>
    %11 = arith.negf %10 : vector<2x128xf32>
    %12 = math.exp %11 : vector<2x128xf32>
    %cst_9 = arith.constant 1.000000e+00 : f32
    %13 = vector.broadcast %cst_9 : f32 to vector<2x128xf32>
    %14 = arith.addf %13, %12 : vector<2x128xf32>
    %15 = arith.divf %13, %14 : vector<2x128xf32>
    %16 = vector.extract_strided_slice %15 {offsets = [0, 0], sizes = [2, 32], strides = [1, 1]} : vector<2x128xf32> to vector<2x32xf32>
    %17 = vector.extract_strided_slice %15 {offsets = [0, 32], sizes = [2, 32], strides = [1, 1]} : vector<2x128xf32> to vector<2x32xf32>
    %18 = vector.extract_strided_slice %15 {offsets = [0, 64], sizes = [2, 32], strides = [1, 1]} : vector<2x128xf32> to vector<2x32xf32>
    %cst_10 = arith.constant 2.000000e+00 : f32
    %19 = vector.broadcast %cst_10 : f32 to vector<2x32xf32>
    %20 = arith.mulf %19, %18 : vector<2x32xf32>
    %cst_11 = arith.constant 1.000000e+00 : f32
    %21 = vector.broadcast %cst_11 : f32 to vector<2x32xf32>
    %22 = arith.subf %20, %21 : vector<2x32xf32>
    %23 = vector.extract_strided_slice %15 {offsets = [0, 96], sizes = [2, 32], strides = [1, 1]} : vector<2x128xf32> to vector<2x32xf32>
    %24 = arith.mulf %17, %5 : vector<2x32xf32>
    %25 = arith.mulf %16, %22 : vector<2x32xf32>
    %26 = arith.addf %24, %25 : vector<2x32xf32>
    %27 = math.tanh %26 : vector<2x32xf32>
    %28 = arith.mulf %23, %27 : vector<2x32xf32>
    %29 = arith.index_cast %c0_i32_6 : i32 to index
    %c0_12 = arith.constant 0 : index
    %c0_13 = arith.constant 0 : index
    %30 = vector.load %arg6[%29, %c0_12, %c0_13] : memref<8x2x32xf32, #tpu.memory_space<vmem>>, vector<1x2x32xf32>
    %31 = vector.shape_cast %30 : vector<1x2x32xf32> to vector<2x32xf32>
    %32 = vector.shape_cast %28 : vector<2x32xf32> to vector<1x2x32xf32>
    tpu.vector_store %arg6[%29, %c0_12, %c0_13], %32 {strides = array<i32>} : memref<8x2x32xf32, #tpu.memory_space<vmem>>, vector<1x2x32xf32>,
    %c1_i32 = arith.constant 1 : i32
    %33 = arith.index_cast %c1_i32 : i32 to index
    %c0_14 = arith.constant 0 : index
    %c0_15 = arith.constant 0 : index
    %34 = vector.load %arg2[%33, %c0_14, %c0_15] : memref<8x2x128xf32, #tpu.memory_space<vmem>>, vector<1x2x128xf32>
    %35 = vector.shape_cast %34 : vector<1x2x128xf32> to vector<2x128xf32>
    %cst_16 = arith.constant dense<0.000000e+00> : vector<2x128xf32>
    %36 = tpu.matmul %28, %3, %cst_16 {dimension_numbers = #tpu.dot_dimension_numbers<[1], [0], [0], [1], [0, 0, 1, 1], [], []>} : vector<2x32xf32>, vector<32x128xf32>, vector<2x128xf32> -> vector<2x128xf32>
    %37 = arith.addf %35, %36 : vector<2x128xf32>
    %38 = arith.negf %37 : vector<2x128xf32>
    %39 = math.exp %38 : vector<2x128xf32>
    %cst_17 = arith.constant 1.000000e+00 : f32
    %40 = vector.broadcast %cst_17 : f32 to vector<2x128xf32>
    %41 = arith.addf %40, %39 : vector<2x128xf32>
    %42 = arith.divf %40, %41 : vector<2x128xf32>
    %43 = vector.extract_strided_slice %42 {offsets = [0, 0], sizes = [2, 32], strides = [1, 1]} : vector<2x128xf32> to vector<2x32xf32>
    %44 = vector.extract_strided_slice %42 {offsets = [0, 32], sizes = [2, 32], strides = [1, 1]} : vector<2x128xf32> to vector<2x32xf32>
    %45 = vector.extract_strided_slice %42 {offsets = [0, 64], sizes = [2, 32], strides = [1, 1]} : vector<2x128xf32> to vector<2x32xf32>
    %cst_18 = arith.constant 2.000000e+00 : f32
    %46 = vector.broadcast %cst_18 : f32 to vector<2x32xf32>
    %47 = arith.mulf %46, %45 : vector<2x32xf32>
    %cst_19 = arith.constant 1.000000e+00 : f32
    %48 = vector.broadcast %cst_19 : f32 to vector<2x32xf32>
    %49 = arith.subf %47, %48 : vector<2x32xf32>
    %50 = vector.extract_strided_slice %42 {offsets = [0, 96], sizes = [2, 32], strides = [1, 1]} : vector<2x128xf32> to vector<2x32xf32>
    %51 = arith.mulf %44, %26 : vector<2x32xf32>
    %52 = arith.mulf %43, %49 : vector<2x32xf32>
    %53 = arith.addf %51, %52 : vector<2x32xf32>
    %54 = math.tanh %53 : vector<2x32xf32>
    %55 = arith.mulf %50, %54 : vector<2x32xf32>
    %56 = arith.index_cast %c1_i32 : i32 to index
    %c0_20 = arith.constant 0 : index
    %c0_21 = arith.constant 0 : index
    %57 = vector.load %arg6[%56, %c0_20, %c0_21] : memref<8x2x32xf32, #tpu.memory_space<vmem>>, vector<1x2x32xf32>
    %58 = vector.shape_cast %57 : vector<1x2x32xf32> to vector<2x32xf32>
    %59 = vector.shape_cast %55 : vector<2x32xf32> to vector<1x2x32xf32>
    tpu.vector_store %arg6[%56, %c0_20, %c0_21], %59 {strides = array<i32>} : memref<8x2x32xf32, #tpu.memory_space<vmem>>, vector<1x2x32xf32>,
    %c2_i32 = arith.constant 2 : i32
    %60 = arith.index_cast %c2_i32 : i32 to index
    %c0_22 = arith.constant 0 : index
    %c0_23 = arith.constant 0 : index
    %61 = vector.load %arg2[%60, %c0_22, %c0_23] : memref<8x2x128xf32, #tpu.memory_space<vmem>>, vector<1x2x128xf32>
    %62 = vector.shape_cast %61 : vector<1x2x128xf32> to vector<2x128xf32>
    %cst_24 = arith.constant dense<0.000000e+00> : vector<2x128xf32>
    %63 = tpu.matmul %55, %3, %cst_24 {dimension_numbers = #tpu.dot_dimension_numbers<[1], [0], [0], [1], [0, 0, 1, 1], [], []>} : vector<2x32xf32>, vector<32x128xf32>, vector<2x128xf32> -> vector<2x128xf32>
    %64 = arith.addf %62, %63 : vector<2x128xf32>
    %65 = arith.negf %64 : vector<2x128xf32>
    %66 = math.exp %65 : vector<2x128xf32>
    %cst_25 = arith.constant 1.000000e+00 : f32
    %67 = vector.broadcast %cst_25 : f32 to vector<2x128xf32>
    %68 = arith.addf %67, %66 : vector<2x128xf32>
    %69 = arith.divf %67, %68 : vector<2x128xf32>
    %70 = vector.extract_strided_slice %69 {offsets = [0, 0], sizes = [2, 32], strides = [1, 1]} : vector<2x128xf32> to vector<2x32xf32>
    %71 = vector.extract_strided_slice %69 {offsets = [0, 32], sizes = [2, 32], strides = [1, 1]} : vector<2x128xf32> to vector<2x32xf32>
    %72 = vector.extract_strided_slice %69 {offsets = [0, 64], sizes = [2, 32], strides = [1, 1]} : vector<2x128xf32> to vector<2x32xf32>
    %cst_26 = arith.constant 2.000000e+00 : f32
    %73 = vector.broadcast %cst_26 : f32 to vector<2x32xf32>
    %74 = arith.mulf %73, %72 : vector<2x32xf32>
    %cst_27 = arith.constant 1.000000e+00 : f32
    %75 = vector.broadcast %cst_27 : f32 to vector<2x32xf32>
    %76 = arith.subf %74, %75 : vector<2x32xf32>
    %77 = vector.extract_strided_slice %69 {offsets = [0, 96], sizes = [2, 32], strides = [1, 1]} : vector<2x128xf32> to vector<2x32xf32>
    %78 = arith.mulf %71, %53 : vector<2x32xf32>
    %79 = arith.mulf %70, %76 : vector<2x32xf32>
    %80 = arith.addf %78, %79 : vector<2x32xf32>
    %81 = math.tanh %80 : vector<2x32xf32>
    %82 = arith.mulf %77, %81 : vector<2x32xf32>
    %83 = arith.index_cast %c2_i32 : i32 to index
    %c0_28 = arith.constant 0 : index
    %c0_29 = arith.constant 0 : index
    %84 = vector.load %arg6[%83, %c0_28, %c0_29] : memref<8x2x32xf32, #tpu.memory_space<vmem>>, vector<1x2x32xf32>
    %85 = vector.shape_cast %84 : vector<1x2x32xf32> to vector<2x32xf32>
    %86 = vector.shape_cast %82 : vector<2x32xf32> to vector<1x2x32xf32>
    tpu.vector_store %arg6[%83, %c0_28, %c0_29], %86 {strides = array<i32>} : memref<8x2x32xf32, #tpu.memory_space<vmem>>, vector<1x2x32xf32>,
    %c3_i32 = arith.constant 3 : i32
    %87 = arith.index_cast %c3_i32 : i32 to index
    %c0_30 = arith.constant 0 : index
    %c0_31 = arith.constant 0 : index
    %88 = vector.load %arg2[%87, %c0_30, %c0_31] : memref<8x2x128xf32, #tpu.memory_space<vmem>>, vector<1x2x128xf32>
    %89 = vector.shape_cast %88 : vector<1x2x128xf32> to vector<2x128xf32>
    %cst_32 = arith.constant dense<0.000000e+00> : vector<2x128xf32>
    %90 = tpu.matmul %82, %3, %cst_32 {dimension_numbers = #tpu.dot_dimension_numbers<[1], [0], [0], [1], [0, 0, 1, 1], [], []>} : vector<2x32xf32>, vector<32x128xf32>, vector<2x128xf32> -> vector<2x128xf32>
    %91 = arith.addf %89, %90 : vector<2x128xf32>
    %92 = arith.negf %91 : vector<2x128xf32>
    %93 = math.exp %92 : vector<2x128xf32>
    %cst_33 = arith.constant 1.000000e+00 : f32
    %94 = vector.broadcast %cst_33 : f32 to vector<2x128xf32>
    %95 = arith.addf %94, %93 : vector<2x128xf32>
    %96 = arith.divf %94, %95 : vector<2x128xf32>
    %97 = vector.extract_strided_slice %96 {offsets = [0, 0], sizes = [2, 32], strides = [1, 1]} : vector<2x128xf32> to vector<2x32xf32>
    %98 = vector.extract_strided_slice %96 {offsets = [0, 32], sizes = [2, 32], strides = [1, 1]} : vector<2x128xf32> to vector<2x32xf32>
    %99 = vector.extract_strided_slice %96 {offsets = [0, 64], sizes = [2, 32], strides = [1, 1]} : vector<2x128xf32> to vector<2x32xf32>
    %cst_34 = arith.constant 2.000000e+00 : f32
    %100 = vector.broadcast %cst_34 : f32 to vector<2x32xf32>
    %101 = arith.mulf %100, %99 : vector<2x32xf32>
    %cst_35 = arith.constant 1.000000e+00 : f32
    %102 = vector.broadcast %cst_35 : f32 to vector<2x32xf32>
    %103 = arith.subf %101, %102 : vector<2x32xf32>
    %104 = vector.extract_strided_slice %96 {offsets = [0, 96], sizes = [2, 32], strides = [1, 1]} : vector<2x128xf32> to vector<2x32xf32>
    %105 = arith.mulf %98, %80 : vector<2x32xf32>
    %106 = arith.mulf %97, %103 : vector<2x32xf32>
    %107 = arith.addf %105, %106 : vector<2x32xf32>
    %108 = math.tanh %107 : vector<2x32xf32>
    %109 = arith.mulf %104, %108 : vector<2x32xf32>
    %110 = arith.index_cast %c3_i32 : i32 to index
    %c0_36 = arith.constant 0 : index
    %c0_37 = arith.constant 0 : index
    %111 = vector.load %arg6[%110, %c0_36, %c0_37] : memref<8x2x32xf32, #tpu.memory_space<vmem>>, vector<1x2x32xf32>
    %112 = vector.shape_cast %111 : vector<1x2x32xf32> to vector<2x32xf32>
    %113 = vector.shape_cast %109 : vector<2x32xf32> to vector<1x2x32xf32>
    tpu.vector_store %arg6[%110, %c0_36, %c0_37], %113 {strides = array<i32>} : memref<8x2x32xf32, #tpu.memory_space<vmem>>, vector<1x2x32xf32>,
    %c4_i32 = arith.constant 4 : i32
    %114 = arith.index_cast %c4_i32 : i32 to index
    %c0_38 = arith.constant 0 : index
    %c0_39 = arith.constant 0 : index
    %115 = vector.load %arg2[%114, %c0_38, %c0_39] : memref<8x2x128xf32, #tpu.memory_space<vmem>>, vector<1x2x128xf32>
    %116 = vector.shape_cast %115 : vector<1x2x128xf32> to vector<2x128xf32>
    %cst_40 = arith.constant dense<0.000000e+00> : vector<2x128xf32>
    %117 = tpu.matmul %109, %3, %cst_40 {dimension_numbers = #tpu.dot_dimension_numbers<[1], [0], [0], [1], [0, 0, 1, 1], [], []>} : vector<2x32xf32>, vector<32x128xf32>, vector<2x128xf32> -> vector<2x128xf32>
    %118 = arith.addf %116, %117 : vector<2x128xf32>
    %119 = arith.negf %118 : vector<2x128xf32>
    %120 = math.exp %119 : vector<2x128xf32>
    %cst_41 = arith.constant 1.000000e+00 : f32
    %121 = vector.broadcast %cst_41 : f32 to vector<2x128xf32>
    %122 = arith.addf %121, %120 : vector<2x128xf32>
    %123 = arith.divf %121, %122 : vector<2x128xf32>
    %124 = vector.extract_strided_slice %123 {offsets = [0, 0], sizes = [2, 32], strides = [1, 1]} : vector<2x128xf32> to vector<2x32xf32>
    %125 = vector.extract_strided_slice %123 {offsets = [0, 32], sizes = [2, 32], strides = [1, 1]} : vector<2x128xf32> to vector<2x32xf32>
    %126 = vector.extract_strided_slice %123 {offsets = [0, 64], sizes = [2, 32], strides = [1, 1]} : vector<2x128xf32> to vector<2x32xf32>
    %cst_42 = arith.constant 2.000000e+00 : f32
    %127 = vector.broadcast %cst_42 : f32 to vector<2x32xf32>
    %128 = arith.mulf %127, %126 : vector<2x32xf32>
    %cst_43 = arith.constant 1.000000e+00 : f32
    %129 = vector.broadcast %cst_43 : f32 to vector<2x32xf32>
    %130 = arith.subf %128, %129 : vector<2x32xf32>
    %131 = vector.extract_strided_slice %123 {offsets = [0, 96], sizes = [2, 32], strides = [1, 1]} : vector<2x128xf32> to vector<2x32xf32>
    %132 = arith.mulf %125, %107 : vector<2x32xf32>
    %133 = arith.mulf %124, %130 : vector<2x32xf32>
    %134 = arith.addf %132, %133 : vector<2x32xf32>
    %135 = math.tanh %134 : vector<2x32xf32>
    %136 = arith.mulf %131, %135 : vector<2x32xf32>
    %137 = arith.index_cast %c4_i32 : i32 to index
    %c0_44 = arith.constant 0 : index
    %c0_45 = arith.constant 0 : index
    %138 = vector.load %arg6[%137, %c0_44, %c0_45] : memref<8x2x32xf32, #tpu.memory_space<vmem>>, vector<1x2x32xf32>
    %139 = vector.shape_cast %138 : vector<1x2x32xf32> to vector<2x32xf32>
    %140 = vector.shape_cast %136 : vector<2x32xf32> to vector<1x2x32xf32>
    tpu.vector_store %arg6[%137, %c0_44, %c0_45], %140 {strides = array<i32>} : memref<8x2x32xf32, #tpu.memory_space<vmem>>, vector<1x2x32xf32>,
    %c5_i32 = arith.constant 5 : i32
    %141 = arith.index_cast %c5_i32 : i32 to index
    %c0_46 = arith.constant 0 : index
    %c0_47 = arith.constant 0 : index
    %142 = vector.load %arg2[%141, %c0_46, %c0_47] : memref<8x2x128xf32, #tpu.memory_space<vmem>>, vector<1x2x128xf32>
    %143 = vector.shape_cast %142 : vector<1x2x128xf32> to vector<2x128xf32>
    %cst_48 = arith.constant dense<0.000000e+00> : vector<2x128xf32>
    %144 = tpu.matmul %136, %3, %cst_48 {dimension_numbers = #tpu.dot_dimension_numbers<[1], [0], [0], [1], [0, 0, 1, 1], [], []>} : vector<2x32xf32>, vector<32x128xf32>, vector<2x128xf32> -> vector<2x128xf32>
    %145 = arith.addf %143, %144 : vector<2x128xf32>
    %146 = arith.negf %145 : vector<2x128xf32>
    %147 = math.exp %146 : vector<2x128xf32>
    %cst_49 = arith.constant 1.000000e+00 : f32
    %148 = vector.broadcast %cst_49 : f32 to vector<2x128xf32>
    %149 = arith.addf %148, %147 : vector<2x128xf32>
    %150 = arith.divf %148, %149 : vector<2x128xf32>
    %151 = vector.extract_strided_slice %150 {offsets = [0, 0], sizes = [2, 32], strides = [1, 1]} : vector<2x128xf32> to vector<2x32xf32>
    %152 = vector.extract_strided_slice %150 {offsets = [0, 32], sizes = [2, 32], strides = [1, 1]} : vector<2x128xf32> to vector<2x32xf32>
    %153 = vector.extract_strided_slice %150 {offsets = [0, 64], sizes = [2, 32], strides = [1, 1]} : vector<2x128xf32> to vector<2x32xf32>
    %cst_50 = arith.constant 2.000000e+00 : f32
    %154 = vector.broadcast %cst_50 : f32 to vector<2x32xf32>
    %155 = arith.mulf %154, %153 : vector<2x32xf32>
    %cst_51 = arith.constant 1.000000e+00 : f32
    %156 = vector.broadcast %cst_51 : f32 to vector<2x32xf32>
    %157 = arith.subf %155, %156 : vector<2x32xf32>
    %158 = vector.extract_strided_slice %150 {offsets = [0, 96], sizes = [2, 32], strides = [1, 1]} : vector<2x128xf32> to vector<2x32xf32>
    %159 = arith.mulf %152, %134 : vector<2x32xf32>
    %160 = arith.mulf %151, %157 : vector<2x32xf32>
    %161 = arith.addf %159, %160 : vector<2x32xf32>
    %162 = math.tanh %161 : vector<2x32xf32>
    %163 = arith.mulf %158, %162 : vector<2x32xf32>
    %164 = arith.index_cast %c5_i32 : i32 to index
    %c0_52 = arith.constant 0 : index
    %c0_53 = arith.constant 0 : index
    %165 = vector.load %arg6[%164, %c0_52, %c0_53] : memref<8x2x32xf32, #tpu.memory_space<vmem>>, vector<1x2x32xf32>
    %166 = vector.shape_cast %165 : vector<1x2x32xf32> to vector<2x32xf32>
    %167 = vector.shape_cast %163 : vector<2x32xf32> to vector<1x2x32xf32>
    tpu.vector_store %arg6[%164, %c0_52, %c0_53], %167 {strides = array<i32>} : memref<8x2x32xf32, #tpu.memory_space<vmem>>, vector<1x2x32xf32>,
    %c6_i32 = arith.constant 6 : i32
    %168 = arith.index_cast %c6_i32 : i32 to index
    %c0_54 = arith.constant 0 : index
    %c0_55 = arith.constant 0 : index
    %169 = vector.load %arg2[%168, %c0_54, %c0_55] : memref<8x2x128xf32, #tpu.memory_space<vmem>>, vector<1x2x128xf32>
    %170 = vector.shape_cast %169 : vector<1x2x128xf32> to vector<2x128xf32>
    %cst_56 = arith.constant dense<0.000000e+00> : vector<2x128xf32>
    %171 = tpu.matmul %163, %3, %cst_56 {dimension_numbers = #tpu.dot_dimension_numbers<[1], [0], [0], [1], [0, 0, 1, 1], [], []>} : vector<2x32xf32>, vector<32x128xf32>, vector<2x128xf32> -> vector<2x128xf32>
    %172 = arith.addf %170, %171 : vector<2x128xf32>
    %173 = arith.negf %172 : vector<2x128xf32>
    %174 = math.exp %173 : vector<2x128xf32>
    %cst_57 = arith.constant 1.000000e+00 : f32
    %175 = vector.broadcast %cst_57 : f32 to vector<2x128xf32>
    %176 = arith.addf %175, %174 : vector<2x128xf32>
    %177 = arith.divf %175, %176 : vector<2x128xf32>
    %178 = vector.extract_strided_slice %177 {offsets = [0, 0], sizes = [2, 32], strides = [1, 1]} : vector<2x128xf32> to vector<2x32xf32>
    %179 = vector.extract_strided_slice %177 {offsets = [0, 32], sizes = [2, 32], strides = [1, 1]} : vector<2x128xf32> to vector<2x32xf32>
    %180 = vector.extract_strided_slice %177 {offsets = [0, 64], sizes = [2, 32], strides = [1, 1]} : vector<2x128xf32> to vector<2x32xf32>
    %cst_58 = arith.constant 2.000000e+00 : f32
    %181 = vector.broadcast %cst_58 : f32 to vector<2x32xf32>
    %182 = arith.mulf %181, %180 : vector<2x32xf32>
    %cst_59 = arith.constant 1.000000e+00 : f32
    %183 = vector.broadcast %cst_59 : f32 to vector<2x32xf32>
    %184 = arith.subf %182, %183 : vector<2x32xf32>
    %185 = vector.extract_strided_slice %177 {offsets = [0, 96], sizes = [2, 32], strides = [1, 1]} : vector<2x128xf32> to vector<2x32xf32>
    %186 = arith.mulf %179, %161 : vector<2x32xf32>
    %187 = arith.mulf %178, %184 : vector<2x32xf32>
    %188 = arith.addf %186, %187 : vector<2x32xf32>
    %189 = math.tanh %188 : vector<2x32xf32>
    %190 = arith.mulf %185, %189 : vector<2x32xf32>
    %191 = arith.index_cast %c6_i32 : i32 to index
    %c0_60 = arith.constant 0 : index
    %c0_61 = arith.constant 0 : index
    %192 = vector.load %arg6[%191, %c0_60, %c0_61] : memref<8x2x32xf32, #tpu.memory_space<vmem>>, vector<1x2x32xf32>
    %193 = vector.shape_cast %192 : vector<1x2x32xf32> to vector<2x32xf32>
    %194 = vector.shape_cast %190 : vector<2x32xf32> to vector<1x2x32xf32>
    tpu.vector_store %arg6[%191, %c0_60, %c0_61], %194 {strides = array<i32>} : memref<8x2x32xf32, #tpu.memory_space<vmem>>, vector<1x2x32xf32>,
    %c7_i32 = arith.constant 7 : i32
    %195 = arith.index_cast %c7_i32 : i32 to index
    %c0_62 = arith.constant 0 : index
    %c0_63 = arith.constant 0 : index
    %196 = vector.load %arg2[%195, %c0_62, %c0_63] : memref<8x2x128xf32, #tpu.memory_space<vmem>>, vector<1x2x128xf32>
    %197 = vector.shape_cast %196 : vector<1x2x128xf32> to vector<2x128xf32>
    %cst_64 = arith.constant dense<0.000000e+00> : vector<2x128xf32>
    %198 = tpu.matmul %190, %3, %cst_64 {dimension_numbers = #tpu.dot_dimension_numbers<[1], [0], [0], [1], [0, 0, 1, 1], [], []>} : vector<2x32xf32>, vector<32x128xf32>, vector<2x128xf32> -> vector<2x128xf32>
    %199 = arith.addf %197, %198 : vector<2x128xf32>
    %200 = arith.negf %199 : vector<2x128xf32>
    %201 = math.exp %200 : vector<2x128xf32>
    %cst_65 = arith.constant 1.000000e+00 : f32
    %202 = vector.broadcast %cst_65 : f32 to vector<2x128xf32>
    %203 = arith.addf %202, %201 : vector<2x128xf32>
    %204 = arith.divf %202, %203 : vector<2x128xf32>
    %205 = vector.extract_strided_slice %204 {offsets = [0, 0], sizes = [2, 32], strides = [1, 1]} : vector<2x128xf32> to vector<2x32xf32>
    %206 = vector.extract_strided_slice %204 {offsets = [0, 32], sizes = [2, 32], strides = [1, 1]} : vector<2x128xf32> to vector<2x32xf32>
    %207 = vector.extract_strided_slice %204 {offsets = [0, 64], sizes = [2, 32], strides = [1, 1]} : vector<2x128xf32> to vector<2x32xf32>
    %cst_66 = arith.constant 2.000000e+00 : f32
    %208 = vector.broadcast %cst_66 : f32 to vector<2x32xf32>
    %209 = arith.mulf %208, %207 : vector<2x32xf32>
    %cst_67 = arith.constant 1.000000e+00 : f32
    %210 = vector.broadcast %cst_67 : f32 to vector<2x32xf32>
    %211 = arith.subf %209, %210 : vector<2x32xf32>
    %212 = vector.extract_strided_slice %204 {offsets = [0, 96], sizes = [2, 32], strides = [1, 1]} : vector<2x128xf32> to vector<2x32xf32>
    %213 = arith.mulf %206, %188 : vector<2x32xf32>
    %214 = arith.mulf %205, %211 : vector<2x32xf32>
    %215 = arith.addf %213, %214 : vector<2x32xf32>
    %216 = math.tanh %215 : vector<2x32xf32>
    %217 = arith.mulf %212, %216 : vector<2x32xf32>
    %218 = arith.index_cast %c7_i32 : i32 to index
    %c0_68 = arith.constant 0 : index
    %c0_69 = arith.constant 0 : index
    %219 = vector.load %arg6[%218, %c0_68, %c0_69] : memref<8x2x32xf32, #tpu.memory_space<vmem>>, vector<1x2x32xf32>
    %220 = vector.shape_cast %219 : vector<1x2x32xf32> to vector<2x32xf32>
    %221 = vector.shape_cast %217 : vector<2x32xf32> to vector<1x2x32xf32>
    tpu.vector_store %arg6[%218, %c0_68, %c0_69], %221 {strides = array<i32>} : memref<8x2x32xf32, #tpu.memory_space<vmem>>, vector<1x2x32xf32>,
    %c8_i32 = arith.constant 8 : i32
    %c0_70 = arith.constant 0 : index
    %c0_71 = arith.constant 0 : index
    %222 = vector.load %arg9[%c0_70, %c0_71] : memref<2x32xf32, #tpu.memory_space<vmem>>, vector<2x32xf32>
    tpu.vector_store %arg9[%c0_70, %c0_71], %217 {strides = array<i32>} : memref<2x32xf32, #tpu.memory_space<vmem>>, vector<2x32xf32>,
    %c0_72 = arith.constant 0 : index
    %c0_73 = arith.constant 0 : index
    %223 = vector.load %arg10[%c0_72, %c0_73] : memref<2x32xf32, #tpu.memory_space<vmem>>, vector<2x32xf32>
    tpu.vector_store %arg10[%c0_72, %c0_73], %215 {strides = array<i32>} : memref<2x32xf32, #tpu.memory_space<vmem>>, vector<2x32xf32>,
    %c0_i32_74 = arith.constant 0 : i32
    %224 = arith.cmpi eq, %arg1, %c0_i32_74 : i32
    %225 = arith.extui %224 : i1 to i32
    %c0_i32_75 = arith.constant 0 : i32
    %226 = arith.cmpi ne, %225, %c0_i32_75 : i32
    scf.if %226 {
      %c0_76 = arith.constant 0 : index
      %c0_77 = arith.constant 0 : index
      %227 = vector.load %arg7[%c0_76, %c0_77] : memref<2x32xf32, #tpu.memory_space<vmem>>, vector<2x32xf32>
      tpu.vector_store %arg7[%c0_76, %c0_77], %217 {strides = array<i32>} : memref<2x32xf32, #tpu.memory_space<vmem>>, vector<2x32xf32>,
      %c0_78 = arith.constant 0 : index
      %c0_79 = arith.constant 0 : index
      %228 = vector.load %arg8[%c0_78, %c0_79] : memref<2x32xf32, #tpu.memory_space<vmem>>, vector<2x32xf32>
      tpu.vector_store %arg8[%c0_78, %c0_79], %215 {strides = array<i32>} : memref<2x32xf32, #tpu.memory_space<vmem>>, vector<2x32xf32>,
    } else {
    }
    return
  }
  func.func @transform_0(%arg0: i32, %arg1: i32) -> (i32, i32, i32) {
    %c0_i32 = arith.constant 0 : i32
    %c0_i32_0 = arith.constant 0 : i32
    return %arg1, %arg0, %c0_i32 : i32, i32, i32
  }
  func.func @transform_1(%arg0: i32, %arg1: i32) -> (i32, i32) {
    %c0_i32 = arith.constant 0 : i32
    %c0_i32_0 = arith.constant 0 : i32
    %c0_i32_1 = arith.constant 0 : i32
    return %c0_i32, %c0_i32_0 : i32, i32
  }
  func.func @transform_2(%arg0: i32, %arg1: i32) -> (i32, i32) {
    %c0_i32 = arith.constant 0 : i32
    %c0_i32_0 = arith.constant 0 : i32
    return %arg0, %c0_i32 : i32, i32
  }
  func.func @transform_3(%arg0: i32, %arg1: i32) -> (i32, i32) {
    %c0_i32 = arith.constant 0 : i32
    %c0_i32_0 = arith.constant 0 : i32
    return %arg0, %c0_i32 : i32, i32
  }
  func.func @transform_4(%arg0: i32, %arg1: i32) -> (i32, i32, i32) {
    %c0_i32 = arith.constant 0 : i32
    %c0_i32_0 = arith.constant 0 : i32
    return %arg1, %arg0, %c0_i32 : i32, i32, i32
  }
  func.func @transform_5(%arg0: i32, %arg1: i32) -> (i32, i32) {
    %c0_i32 = arith.constant 0 : i32
    %c0_i32_0 = arith.constant 0 : i32
    return %arg0, %c0_i32 : i32, i32
  }
  func.func @transform_6(%arg0: i32, %arg1: i32) -> (i32, i32) {
    %c0_i32 = arith.constant 0 : i32
    %c0_i32_0 = arith.constant 0 : i32
    return %arg0, %c0_i32 : i32, i32
  }
}

</mosaic_0001>

<bundles_post_ra>
// kernel: tpu_custom_call.1
= control target key start
LH: loop header
LB: loop body
LE: loop exit
PB: predicated region body
PF: predicated region fallthrough
CT: control target
= control target key end

     0   :  { %12 = vsyncpa [#allocation5], 0  ;;  %s1596_s0 = inlined_call_operand.hbm [shape: f32[8,2,128], index: 0, kind: input, shape index: {}]   ;;  %s1597_s1 = inlined_call_operand.hbm [shape: f32[32,128], index: 1, kind: input, shape index: {}]   ;;  %s1598_s2 = inlined_call_operand.vmem [shape: f32[2,32], index: 2, kind: input, shape index: {}]   ;;  %s1599_s3 = inlined_call_operand.vmem [shape: f32[2,32], index: 3, kind: input, shape index: {}]   ;;  %s1600_s4 = inlined_call_operand.hbm [shape: f32[8,2,32], index: 4, kind: output, shape index: {0}]   ;;  %s1601_s5 = inlined_call_operand.hbm [shape: f32[2,32], index: 5, kind: output, shape index: {1}]   ;;  %s1602_s6 = inlined_call_operand.hbm [shape: f32[2,32], index: 6, kind: output, shape index: {2}]  }
   0x1   :  { %13 = vsyncpa [#allocation8], 0 }
   0x2   :  { %14 = vsyncpa [#allocation6], 0 }
   0x3   :  { %15 = vsyncpa [#allocation11], 0  ;;  %s1354_s21 = smov [#allocation4]   ;;  %s1236_s25 = scalar_lea.hbm %s1596_s0, 256 }
   0x4   :  { %s21_s22 = sshll.u32 %s1354_s21, 4  ;;  %p1237_p0 = scmp.ne.s32.totalorder %s1596_s0, %s1236_s25  ;;  %s22_s22 = int_to_ptr.vmem [resolvable:$true] %s21_s22 }
   0x5   :  { %p1240_p1 = scmp.lt.u32.totalorder %s1236_s25, %s1596_s0 }
   0x7   :  { %p1242_p2 = pnand %p1240_p1, %p1237_p0 }
   0x9   :  { %1245 = shalt.err (!%p1242_p2)
}
   0xa   :  { %s1246_s30 = scalar_lea.vmem %s22_s22, 256  ;;  %p1251_p4 = scmp.lt.s32.totalorder %s22_s22, %s22_s22 }
   0xb   :  { %p1247_p3 = scmp.ne.s32.totalorder %s22_s22, %s1246_s30  ;;  %p1252_p5 = scmp.lt.s32.totalorder %s1246_s30, %s1246_s30 }
   0xd   :  { %p1253_p6 = por %p1252_p5, %p1251_p4 }
   0xf   :  { %p1254_p7 = pnand %p1253_p6, %p1247_p3 }
  0x11   :  { %1257 = shalt.err (!%p1254_p7)
}
  0x12   :  { %s1355_s7 = smov 32   ;;  %s1356_s8 = smov 2  }
  0x13   :  { %27 = dma.hbm_to_vmem [thread:$0]  %s1596_s0, 256, %s22_s22, [#allocation5], %s1355_s7, %s1355_s7, %s1356_s8  }
  0x14   :  { %s1357_s11 = smov [#allocation7]   ;;  %s1258_s15 = scalar_lea.hbm %s1597_s1, 512 }
  0x15   :  { %s33_s12 = sshll.u32 %s1357_s11, 4  ;;  %p1259_p8 = scmp.ne.s32.totalorder %s1597_s1, %s1258_s15  ;;  %s34_s12 = int_to_ptr.vmem [resolvable:$true] %s33_s12 }
  0x16   :  { %p1262_p9 = scmp.lt.u32.totalorder %s1258_s15, %s1597_s1 }
  0x18   :  { %p1264_p10 = pnand %p1262_p9, %p1259_p8 }
  0x1a   :  { %1267 = shalt.err (!%p1264_p10)
}
  0x1b   :  { %s1268_s20 = scalar_lea.vmem %s34_s12, 512  ;;  %p1273_p12 = scmp.lt.s32.totalorder %s34_s12, %s34_s12 }
  0x1c   :  { %p1269_p11 = scmp.ne.s32.totalorder %s34_s12, %s1268_s20  ;;  %p1274_p13 = scmp.lt.s32.totalorder %s1268_s20, %s1268_s20 }
  0x1e   :  { %p1275_p0 = por %p1274_p13, %p1273_p12 }
  0x20   :  { %p1276_p1 = pnand %p1275_p0, %p1269_p11 }
  0x22   :  { %1279 = shalt.err (!%p1276_p1)
}
  0x23   :  { %s1358_s0 = smov 128   ;;  %s1359_s21 = smov 8  }
  0x24   :  { %39 = dma.hbm_to_vmem [thread:$0]  %s1597_s1, 512, %s34_s12, [#allocation8], %s1358_s0, %s1358_s0, %s1359_s21  }
  0x25   :  { %1346 = dma.done.wait [#allocation5], 256  }
  0x26   :  { %1347 = vsyncadd [#allocation5], 4294967040 }
  0x27   :  { %1348 = dma.done.wait [#allocation8], 512  }
  0x28   :  { %1349 = vsyncadd [#allocation8], 4294966784  ;;  %v1360_v0 = vmov 0.0|0.0   ;;  %vm1361_vm0 = vmmov 0   ;;  %v1362_v1 = vmov 0.0   ;;  %vm55_vm1 = vcmask 254976  }
  0x29   :  { %1126 = vmatprep.subr.bf16.mxu0 %v1360_v0  ;;  %1046 = vmatprep.mubr.msk.f32.mxu0 %vm1361_vm0, %v1362_v1  ;;  %v59_v2 = vld [vmem:[#allocation7] sm:$0xff]  ;;  %v60_v3 = vld [vmem:[#allocation7 + $0x8] sm:$0xff]  ;;  %v61_v4 = vld [vmem:[#allocation7 + $0x10] sm:$0xff]  ;;  %vm66_vm2 = vcmask 261120   ;;  %s1363_s26 = smov 64   ;;  %s1365_s27 = smov [#allocation10]  }
  0x2a   :  { %1132 = vmatprep.subr.bf16.mxu1 %v1360_v0  ;;  %1057 = vmatprep.mubr.msk.f32.mxu1 %vm1361_vm0, %v1362_v1  ;;  %v1436_v5 = vpack.c.bf16 %v60_v3, %v59_v2  ;;  %v62_v6 = vld [vmem:[#allocation7 + $0x18] sm:$0xff]  ;;  %v54_v7 = vld [vmem:[%s1598_s2] sm:$0x3]  ;;  %v65_v11 = vld [vmem:[#allocation4] sm:$0x3]  ;;  %s947_s28 = sshll.u32 %s1365_s27, 4  ;;  %s948_s28 = int_to_ptr.vmem [resolvable:$true] %s947_s28 }
  0x2b   :  { %56 = vst.msk [vmem:[#allocation2] sm:$0x3] %vm55_vm1, %v54_v7  ;;  %v1443_v8 = vpack.c.bf16 %v62_v6, %v61_v4  ;;  %v57_v10 = vld [vmem:[%s1599_s3] sm:$0x3]  ;;  %v177_v32 = vld [vmem:[#allocation4 + $0x2] sm:$0x3]  ;;  %p1285_p3 = scmp.lt.s32.totalorder %s948_s28, %s948_s28 }
  0x2c   :  { %1128 = vmatpush3.bf16.msra.mxu0 %v1436_v5  ;;  %1134 = vmatpush3.bf16.msra.mxu1 %v1436_v5  ;;  %58 = vst.msk [vmem:[#allocation3] sm:$0x3] %vm55_vm1, %v57_v10  ;;  %v283_v51 = vld [vmem:[#allocation4 + $0x4] sm:$0x3]  ;;  %v389_v10 = vld [vmem:[#allocation4 + $0x6] sm:$0x3] }
  0x2d   :  { %1129 = vmatprep.subr.bf16.mxu0 %v1360_v0  ;;  %1135 = vmatprep.subr.bf16.mxu1 %v1360_v0  ;;  %s1364_s3 = smov 96   ;;  %s1366_s29 = smov [#allocation9]  }
  0x2e   :  { %s934_s30 = sshll.u32 %s1366_s29, 4  ;;  %s1367_s9 = smov [#allocation12]   ;;  %s1540_s30 = int_to_ptr.vmem [resolvable:$true] %s934_s30 }
  0x2f   :  { %s957_s10 = sshll.u32 %s1367_s9, 4  ;;  %s1280_s11 = scalar_lea.vmem %s948_s28, 32  ;;  %s1545_s10 = int_to_ptr.vmem [resolvable:$true] %s957_s10 }
  0x30   :  { %1131 = vmatpush3.bf16.msra.mxu0 %v1443_v8  ;;  %1137 = vmatpush3.bf16.msra.mxu1 %v1443_v8  ;;  %p1281_p2 = scmp.ne.s32.totalorder %s948_s28, %s1280_s11  ;;  %p1286_p4 = scmp.lt.s32.totalorder %s1280_s11, %s1280_s11 }
  0x31   :  { %1138 = vmatprep.subr.bf16.mxu0 %v1360_v0  ;;  %1144 = vmatprep.subr.bf16.mxu1 %v1360_v0 }
  0x32   :  { %v63_v9 = vld [vmem:[#allocation2] sm:$0x3]  ;;  %p1287_p5 = por %p1286_p4, %p1285_p3 }
  0x33   :  { %1047 = vmatmul.mubr.msk.f32.vlgmr.msra.gmra.mrb[0].mxu0 %vm66_vm2, %v63_v9  ;;  %v64_v21 = vld [vmem:[#allocation3] sm:$0x3] }
  0x34   :  { %1140 = vmatpush3.bf16.msra.mxu0 %v1436_v5  ;;  %1068 = vmatprep.mubr.msk.f32.mxu0 %vm1361_vm0, %v1362_v1  ;;  %p1288_p6 = pnand %p1287_p5, %p1281_p2 }
  0x35   :  { %1141 = vmatprep.subr.bf16.mxu0 %v1360_v0 }
  0x38   :  { %1143 = vmatpush3.bf16.msra.mxu0 %v1443_v8 }
  0x39   :  { %1150 = vmatprep.subr.bf16.mxu0 %v1360_v0 }
 0x106   :  { %v136_v12 = vpop.f32.mrb[0].mxu0 }
 0x107   :  { %v140_v13 = vadd.f32 %v136_v12, %v65_v11  ;;  %v1048_v14 = vpop.f32.mrb[1].mxu0 }
 0x109   :  { %v975_v15 = vmul.f32 -1.442695, %v140_v13 }
 0x10b   :  { %1188 = vpow2.f32 %v975_v15 }
 0x115   :  { %v1189_v16 = vpop.eup %1188 }
 0x116   :  { %v144_v17 = vadd.f32 1.0, %v1189_v16 }
 0x118   :  { %1190 = vrcp.f32 %v144_v17 }
 0x122   :  { %v1191_v18 = vpop.eup %1190 }
 0x123   :  { %v147_v19 = vmul.f32 2.0, %v1191_v18 }
 0x125   :  { %v976_v20 = vadd.f32 -1.0, %v147_v19 }
 0x127   :  { %155 = vrot.lane.b32.xlu0 %v976_v20, %s1363_s26 }
 0x12b   :  { %150 = vrot.lane.b32.xlu0 %v64_v21, %s1355_s7 }
 0x199   :  { %v156_v22 = vpop.permute.xlu0 %155 }
 0x19a   :  { %v158_v23 = vmul.f32 %v1191_v18, %v156_v22 }
 0x19c   :  { %160 = vrot.lane.b32.xlu1 %v158_v23, %s1355_s7 }
 0x19d   :  { %v151_v24 = vpop.permute.xlu0 %150 }
 0x19e   :  { %v153_v25 = vmul.f32 %v1191_v18, %v151_v24 }
 0x20e   :  { %v161_v26 = vpop.permute.xlu1 %160 }
 0x20f   :  { %v163_v27 = vadd.f32 %v161_v26, %v153_v25 }
 0x211   :  { %1192 = vtanh.f32 %v163_v27 }
 0x21b   :  { %v1193_v28 = vpop.eup %1192 }
 0x21c   :  { %166 = vrot.lane.b32.xlu1 %v1193_v28, %s1363_s26 }
 0x28e   :  { %v167_v29 = vpop.permute.xlu1 %166 }
 0x28f   :  { %v169_v30 = vmul.f32 %v1191_v18, %v167_v29  ;;  %v495_v29 = vld [vmem:[#allocation4 + $0x8] sm:$0x3] }
 0x291   :  { %171 = vrot.lane.b32.xlu0 %v169_v30, %s1355_s7 }
 0x303   :  { %v172_v31 = vpop.permute.xlu0 %171 }
 0x304   :  { %175 = vst.msk [vmem:[#allocation9] sm:$0x3] %vm55_vm1, %v172_v31  ;;  %1058 = vmatmul.mubr.msk.f32.vlgmr.msra.gmra.mrb[0].mxu1 %vm66_vm2, %v172_v31 }
 0x305   :  { %1146 = vmatpush3.bf16.msra.mxu1 %v1436_v5  ;;  %1079 = vmatprep.mubr.msk.f32.mxu1 %vm1361_vm0, %v1362_v1 }
 0x306   :  { %1147 = vmatprep.subr.bf16.mxu1 %v1360_v0 }
 0x309   :  { %1149 = vmatpush3.bf16.msra.mxu1 %v1443_v8 }
 0x30a   :  { %1156 = vmatprep.subr.bf16.mxu1 %v1360_v0 }
 0x3d7   :  { %v246_v33 = vpop.f32.mrb[0].mxu1 }
 0x3d8   :  { %v250_v34 = vadd.f32 %v246_v33, %v177_v32  ;;  %v1059_v35 = vpop.f32.mrb[1].mxu1 }
 0x3da   :  { %v978_v36 = vmul.f32 -1.442695, %v250_v34 }
 0x3dc   :  { %1194 = vpow2.f32 %v978_v36 }
 0x3e6   :  { %v1195_v37 = vpop.eup %1194 }
 0x3e7   :  { %v254_v38 = vadd.f32 1.0, %v1195_v37 }
 0x3e9   :  { %1196 = vrcp.f32 %v254_v38 }
 0x3f3   :  { %v1197_v39 = vpop.eup %1196 }
 0x3f4   :  { %v257_v40 = vmul.f32 2.0, %v1197_v39  ;;  %v259_v44 = vmul.f32 %v1197_v39, %v163_v27 }
 0x3f6   :  { %v979_v41 = vadd.f32 -1.0, %v257_v40 }
 0x3f8   :  { %261 = vrot.lane.b32.xlu1 %v979_v41, %s1363_s26 }
 0x46a   :  { %v262_v42 = vpop.permute.xlu1 %261 }
 0x46b   :  { %v264_v43 = vmul.f32 %v1197_v39, %v262_v42 }
 0x46d   :  { %266 = vrot.lane.b32.xlu0 %v264_v43, %s1355_s7 }
 0x4df   :  { %v267_v45 = vpop.permute.xlu0 %266 }
 0x4e0   :  { %v269_v46 = vadd.f32 %v267_v45, %v259_v44 }
 0x4e2   :  { %1198 = vtanh.f32 %v269_v46 }
 0x4ec   :  { %v1199_v47 = vpop.eup %1198 }
 0x4ed   :  { %272 = vrot.lane.b32.xlu1 %v1199_v47, %s1363_s26 }
 0x55f   :  { %v273_v48 = vpop.permute.xlu1 %272 }
 0x560   :  { %v275_v49 = vmul.f32 %v1197_v39, %v273_v48  ;;  %v601_v48 = vld [vmem:[#allocation4 + $0xa] sm:$0x3] }
 0x562   :  { %277 = vrot.lane.b32.xlu0 %v275_v49, %s1355_s7 }
 0x5d4   :  { %v278_v50 = vpop.permute.xlu0 %277 }
 0x5d5   :  { %281 = vst.msk [vmem:[#allocation9 + $0x2] sm:$0x3] %vm55_vm1, %v278_v50  ;;  %1069 = vmatmul.mubr.msk.f32.vlgmr.msra.gmra.mrb[2].mxu0 %vm66_vm2, %v278_v50 }
 0x5d6   :  { %1152 = vmatpush3.bf16.msra.mxu0 %v1436_v5  ;;  %1090 = vmatprep.mubr.msk.f32.mxu0 %vm1361_vm0, %v1362_v1 }
 0x5d7   :  { %1153 = vmatprep.subr.bf16.mxu0 %v1360_v0 }
 0x5da   :  { %1155 = vmatpush3.bf16.msra.mxu0 %v1443_v8 }
 0x5db   :  { %1162 = vmatprep.subr.bf16.mxu0 %v1360_v0 }
 0x6a8   :  { %v352_v52 = vpop.f32.mrb[2].mxu0 }
 0x6a9   :  { %v356_v53 = vadd.f32 %v352_v52, %v283_v51  ;;  %v1070_v54 = vpop.f32.mrb[3].mxu0 }
 0x6ab   :  { %v981_v55 = vmul.f32 -1.442695, %v356_v53 }
 0x6ad   :  { %1200 = vpow2.f32 %v981_v55 }
 0x6b7   :  { %v1201_v56 = vpop.eup %1200 }
 0x6b8   :  { %v360_v57 = vadd.f32 1.0, %v1201_v56 }
 0x6ba   :  { %1202 = vrcp.f32 %v360_v57 }
 0x6c4   :  { %v1203_v58 = vpop.eup %1202 }
 0x6c5   :  { %v363_v59 = vmul.f32 2.0, %v1203_v58  ;;  %v365_v63 = vmul.f32 %v1203_v58, %v269_v46 }
 0x6c7   :  { %v982_v60 = vadd.f32 -1.0, %v363_v59 }
 0x6c9   :  { %367 = vrot.lane.b32.xlu1 %v982_v60, %s1363_s26 }
 0x73b   :  { %v368_v61 = vpop.permute.xlu1 %367 }
 0x73c   :  { %v370_v62 = vmul.f32 %v1203_v58, %v368_v61 }
 0x73e   :  { %372 = vrot.lane.b32.xlu0 %v370_v62, %s1355_s7 }
 0x7b0   :  { %v373_v2 = vpop.permute.xlu0 %372 }
 0x7b1   :  { %v375_v3 = vadd.f32 %v373_v2, %v365_v63  ;;  %v707_v63 = vld [vmem:[#allocation4 + $0xc] sm:$0x3] }
 0x7b3   :  { %1204 = vtanh.f32 %v375_v3 }
 0x7bd   :  { %v1205_v4 = vpop.eup %1204 }
 0x7be   :  { %378 = vrot.lane.b32.xlu1 %v1205_v4, %s1363_s26 }
 0x830   :  { %v379_v6 = vpop.permute.xlu1 %378 }
 0x831   :  { %v381_v7 = vmul.f32 %v1203_v58, %v379_v6 }
 0x833   :  { %383 = vrot.lane.b32.xlu0 %v381_v7, %s1355_s7 }
 0x8a5   :  { %v384_v9 = vpop.permute.xlu0 %383 }
 0x8a6   :  { %387 = vst.msk [vmem:[#allocation9 + $0x4] sm:$0x3] %vm55_vm1, %v384_v9  ;;  %1080 = vmatmul.mubr.msk.f32.vlgmr.msra.gmra.mrb[2].mxu1 %vm66_vm2, %v384_v9 }
 0x8a7   :  { %1158 = vmatpush3.bf16.msra.mxu1 %v1436_v5  ;;  %1101 = vmatprep.mubr.msk.f32.mxu1 %vm1361_vm0, %v1362_v1 }
 0x8a8   :  { %1159 = vmatprep.subr.bf16.mxu1 %v1360_v0 }
 0x8ab   :  { %1161 = vmatpush3.bf16.msra.mxu1 %v1443_v8 }
 0x8ac   :  { %1168 = vmatprep.subr.bf16.mxu1 %v1360_v0 }
 0x979   :  { %v458_v11 = vpop.f32.mrb[2].mxu1 }
 0x97a   :  { %v462_v12 = vadd.f32 %v458_v11, %v389_v10  ;;  %v1081_v13 = vpop.f32.mrb[3].mxu1 }
 0x97c   :  { %v984_v14 = vmul.f32 -1.442695, %v462_v12 }
 0x97e   :  { %1206 = vpow2.f32 %v984_v14 }
 0x988   :  { %v1207_v15 = vpop.eup %1206 }
 0x989   :  { %v466_v16 = vadd.f32 1.0, %v1207_v15 }
 0x98b   :  { %1208 = vrcp.f32 %v466_v16 }
 0x995   :  { %v1209_v17 = vpop.eup %1208 }
 0x996   :  { %v469_v18 = vmul.f32 2.0, %v1209_v17  ;;  %v471_v22 = vmul.f32 %v1209_v17, %v375_v3 }
 0x998   :  { %v985_v19 = vadd.f32 -1.0, %v469_v18 }
 0x99a   :  { %473 = vrot.lane.b32.xlu1 %v985_v19, %s1363_s26 }
 0xa0c   :  { %v474_v20 = vpop.permute.xlu1 %473 }
 0xa0d   :  { %v476_v21 = vmul.f32 %v1209_v17, %v474_v20 }
 0xa0f   :  { %478 = vrot.lane.b32.xlu0 %v476_v21, %s1355_s7 }
 0xa81   :  { %v479_v23 = vpop.permute.xlu0 %478 }
 0xa82   :  { %v481_v24 = vadd.f32 %v479_v23, %v471_v22  ;;  %v813_v22 = vld [vmem:[#allocation4 + $0xe] sm:$0x3] }
 0xa84   :  { %1210 = vtanh.f32 %v481_v24 }
 0xa8e   :  { %v1211_v25 = vpop.eup %1210 }
 0xa8f   :  { %484 = vrot.lane.b32.xlu1 %v1211_v25, %s1363_s26 }
 0xb01   :  { %v485_v26 = vpop.permute.xlu1 %484 }
 0xb02   :  { %v487_v27 = vmul.f32 %v1209_v17, %v485_v26 }
 0xb04   :  { %489 = vrot.lane.b32.xlu0 %v487_v27, %s1355_s7 }
 0xb76   :  { %v490_v28 = vpop.permute.xlu0 %489 }
 0xb77   :  { %493 = vst.msk [vmem:[#allocation9 + $0x6] sm:$0x3] %vm55_vm1, %v490_v28  ;;  %1091 = vmatmul.mubr.msk.f32.vlgmr.msra.gmra.mrb[4].mxu0 %vm66_vm2, %v490_v28 }
 0xb78   :  { %1164 = vmatpush3.bf16.msra.mxu0 %v1436_v5  ;;  %1112 = vmatprep.mubr.msk.f32.mxu0 %vm1361_vm0, %v1362_v1 }
 0xb79   :  { %1165 = vmatprep.subr.bf16.mxu0 %v1360_v0 }
 0xb7c   :  { %1167 = vmatpush3.bf16.msra.mxu0 %v1443_v8 }
 0xc4a   :  { %v564_v30 = vpop.f32.mrb[4].mxu0 }
 0xc4b   :  { %v568_v31 = vadd.f32 %v564_v30, %v495_v29  ;;  %v1092_v32 = vpop.f32.mrb[5].mxu0 }
 0xc4d   :  { %v987_v33 = vmul.f32 -1.442695, %v568_v31 }
 0xc4f   :  { %1212 = vpow2.f32 %v987_v33 }
 0xc59   :  { %v1213_v34 = vpop.eup %1212 }
 0xc5a   :  { %v572_v35 = vadd.f32 1.0, %v1213_v34 }
 0xc5c   :  { %1214 = vrcp.f32 %v572_v35 }
 0xc66   :  { %v1215_v36 = vpop.eup %1214 }
 0xc67   :  { %v575_v37 = vmul.f32 2.0, %v1215_v36  ;;  %v577_v41 = vmul.f32 %v1215_v36, %v481_v24 }
 0xc69   :  { %v988_v38 = vadd.f32 -1.0, %v575_v37 }
 0xc6b   :  { %579 = vrot.lane.b32.xlu1 %v988_v38, %s1363_s26 }
 0xcdd   :  { %v580_v39 = vpop.permute.xlu1 %579 }
 0xcde   :  { %v582_v40 = vmul.f32 %v1215_v36, %v580_v39 }
 0xce0   :  { %584 = vrot.lane.b32.xlu0 %v582_v40, %s1355_s7 }
 0xd52   :  { %v585_v42 = vpop.permute.xlu0 %584 }
 0xd53   :  { %v587_v43 = vadd.f32 %v585_v42, %v577_v41 }
 0xd55   :  { %1216 = vtanh.f32 %v587_v43 }
 0xd5f   :  { %v1217_v44 = vpop.eup %1216 }
 0xd60   :  { %590 = vrot.lane.b32.xlu1 %v1217_v44, %s1363_s26 }
 0xdd2   :  { %v591_v45 = vpop.permute.xlu1 %590 }
 0xdd3   :  { %v593_v46 = vmul.f32 %v1215_v36, %v591_v45 }
 0xdd5   :  { %595 = vrot.lane.b32.xlu0 %v593_v46, %s1355_s7 }
 0xe47   :  { %v596_v47 = vpop.permute.xlu0 %595 }
 0xe48   :  { %599 = vst.msk [vmem:[#allocation9 + $0x8] sm:$0x3] %vm55_vm1, %v596_v47  ;;  %1102 = vmatmul.mubr.msk.f32.vlgmr.msra.gmra.mrb[4].mxu1 %vm66_vm2, %v596_v47 }
 0xe49   :  { %1170 = vmatpush3.bf16.msra.mxu1 %v1436_v5  ;;  %1123 = vmatprep.mubr.msk.f32.mxu1 %vm1361_vm0, %v1362_v1 }
 0xe4a   :  { %1171 = vmatprep.subr.bf16.mxu1 %v1360_v0 }
 0xe4d   :  { %1173 = vmatpush3.bf16.msra.mxu1 %v1443_v8 }
 0xf1b   :  { %v670_v49 = vpop.f32.mrb[4].mxu1 }
 0xf1c   :  { %v674_v50 = vadd.f32 %v670_v49, %v601_v48  ;;  %v1103_v51 = vpop.f32.mrb[5].mxu1 }
 0xf1e   :  { %v990_v52 = vmul.f32 -1.442695, %v674_v50 }
 0xf20   :  { %1218 = vpow2.f32 %v990_v52 }
 0xf2a   :  { %v1219_v53 = vpop.eup %1218 }
 0xf2b   :  { %v678_v54 = vadd.f32 1.0, %v1219_v53 }
 0xf2d   :  { %1220 = vrcp.f32 %v678_v54 }
 0xf37   :  { %v1221_v55 = vpop.eup %1220 }
 0xf38   :  { %v681_v56 = vmul.f32 2.0, %v1221_v55  ;;  %v683_v0 = vmul.f32 %v1221_v55, %v587_v43 }
 0xf3a   :  { %v991_v57 = vadd.f32 -1.0, %v681_v56 }
 0xf3c   :  { %685 = vrot.lane.b32.xlu1 %v991_v57, %s1363_s26 }
 0xfae   :  { %v686_v5 = vpop.permute.xlu1 %685 }
 0xfaf   :  { %v688_v1 = vmul.f32 %v1221_v55, %v686_v5 }
 0xfb1   :  { %690 = vrot.lane.b32.xlu0 %v688_v1, %s1355_s7 }
0x1023   :  { %v691_v8 = vpop.permute.xlu0 %690 }
0x1024   :  { %v693_v58 = vadd.f32 %v691_v8, %v683_v0 }
0x1026   :  { %1222 = vtanh.f32 %v693_v58 }
0x1030   :  { %v1223_v59 = vpop.eup %1222 }
0x1031   :  { %696 = vrot.lane.b32.xlu1 %v1223_v59, %s1363_s26 }
0x10a3   :  { %v697_v60 = vpop.permute.xlu1 %696 }
0x10a4   :  { %v699_v61 = vmul.f32 %v1221_v55, %v697_v60 }
0x10a6   :  { %701 = vrot.lane.b32.xlu0 %v699_v61, %s1355_s7 }
0x1118   :  { %v702_v62 = vpop.permute.xlu0 %701 }
0x1119   :  { %705 = vst.msk [vmem:[#allocation9 + $0xa] sm:$0x3] %vm55_vm1, %v702_v62  ;;  %1113 = vmatmul.mubr.msk.f32.vlgmr.msra.gmra.mrb[6].mxu0 %vm66_vm2, %v702_v62 }
0x11ec   :  { %v776_v2 = vpop.f32.mrb[6].mxu0 }
0x11ed   :  { %v780_v3 = vadd.f32 %v776_v2, %v707_v63  ;;  %v1114_v4 = vpop.f32.mrb[7].mxu0 }
0x11ef   :  { %v993_v6 = vmul.f32 -1.442695, %v780_v3 }
0x11f1   :  { %1224 = vpow2.f32 %v993_v6 }
0x11fb   :  { %v1225_v7 = vpop.eup %1224 }
0x11fc   :  { %v784_v9 = vadd.f32 1.0, %v1225_v7 }
0x11fe   :  { %1226 = vrcp.f32 %v784_v9 }
0x1208   :  { %v1227_v10 = vpop.eup %1226 }
0x1209   :  { %v787_v11 = vmul.f32 2.0, %v1227_v10  ;;  %v789_v15 = vmul.f32 %v1227_v10, %v693_v58 }
0x120b   :  { %v994_v12 = vadd.f32 -1.0, %v787_v11 }
0x120d   :  { %791 = vrot.lane.b32.xlu1 %v994_v12, %s1363_s26 }
0x127f   :  { %v792_v13 = vpop.permute.xlu1 %791 }
0x1280   :  { %v794_v14 = vmul.f32 %v1227_v10, %v792_v13 }
0x1282   :  { %796 = vrot.lane.b32.xlu0 %v794_v14, %s1355_s7 }
0x12f4   :  { %v797_v16 = vpop.permute.xlu0 %796 }
0x12f5   :  { %v799_v17 = vadd.f32 %v797_v16, %v789_v15 }
0x12f7   :  { %1228 = vtanh.f32 %v799_v17 }
0x1301   :  { %v1229_v18 = vpop.eup %1228 }
0x1302   :  { %802 = vrot.lane.b32.xlu1 %v1229_v18, %s1363_s26 }
0x1374   :  { %v803_v19 = vpop.permute.xlu1 %802 }
0x1375   :  { %v805_v20 = vmul.f32 %v1227_v10, %v803_v19 }
0x1377   :  { %807 = vrot.lane.b32.xlu0 %v805_v20, %s1355_s7 }
0x13e9   :  { %v808_v21 = vpop.permute.xlu0 %807 }
0x13ea   :  { %811 = vst.msk [vmem:[#allocation9 + $0xc] sm:$0x3] %vm55_vm1, %v808_v21  ;;  %1124 = vmatmul.mubr.msk.f32.vlgmr.msra.gmra.mrb[6].mxu1 %vm66_vm2, %v808_v21 }
0x14bd   :  { %v882_v23 = vpop.f32.mrb[6].mxu1 }
0x14be   :  { %v886_v24 = vadd.f32 %v882_v23, %v813_v22  ;;  %v1125_v25 = vpop.f32.mrb[7].mxu1 }
0x14c0   :  { %v996_v26 = vmul.f32 -1.442695, %v886_v24 }
0x14c2   :  { %1230 = vpow2.f32 %v996_v26 }
0x14cc   :  { %v1231_v27 = vpop.eup %1230 }
0x14cd   :  { %v890_v28 = vadd.f32 1.0, %v1231_v27 }
0x14cf   :  { %1232 = vrcp.f32 %v890_v28 }
0x14d9   :  { %v1233_v29 = vpop.eup %1232 }
0x14da   :  { %v893_v30 = vmul.f32 2.0, %v1233_v29  ;;  %v895_v34 = vmul.f32 %v1233_v29, %v799_v17 }
0x14dc   :  { %v997_v31 = vadd.f32 -1.0, %v893_v30 }
0x14de   :  { %897 = vrot.lane.b32.xlu1 %v997_v31, %s1363_s26 }
0x1550   :  { %v898_v32 = vpop.permute.xlu1 %897 }
0x1551   :  { %v900_v33 = vmul.f32 %v1233_v29, %v898_v32 }
0x1553   :  { %902 = vrot.lane.b32.xlu0 %v900_v33, %s1355_s7 }
0x15c5   :  { %v903_v35 = vpop.permute.xlu0 %902 }
0x15c6   :  { %v905_v36 = vadd.f32 %v903_v35, %v895_v34 }
0x15c8   :  { %1234 = vtanh.f32 %v905_v36 }
0x15d2   :  { %v1235_v37 = vpop.eup %1234 }
0x15d3   :  { %908 = vrot.lane.b32.xlu1 %v1235_v37, %s1363_s26 }
0x15d7   :  { %920 = vrot.lane.b32.xlu1 %v905_v36, %s1364_s3 }
0x1645   :  { %v909_v38 = vpop.permute.xlu1 %908 }
0x1646   :  { %v911_v39 = vmul.f32 %v1233_v29, %v909_v38 }
0x1648   :  { %913 = vrot.lane.b32.xlu0 %v911_v39, %s1355_s7 }
0x1649   :  { %v921_v40 = vpop.permute.xlu1 %920 }
0x164a   :  { %923 = vst.msk [vmem:[#allocation3] sm:$0x3] %vm55_vm1, %v921_v40  ;;  %928 = vst.msk [vmem:[#allocation12] sm:$0x3] %vm55_vm1, %v921_v40 }
0x16ba   :  { %v914_v41 = vpop.permute.xlu0 %913 }
0x16bb   :  { %917 = vst.msk [vmem:[#allocation9 + $0xe] sm:$0x3] %vm55_vm1, %v914_v41  ;;  %918 = vst.msk [vmem:[#allocation2] sm:$0x3] %vm55_vm1, %v914_v41 }
0x16bc   :  { %927 = vst.msk [vmem:[#allocation10] sm:$0x3] %vm55_vm1, %v914_v41 }
0x16bd   :  { %1291 = shalt.err (!%p1288_p6)
}
0x16be   :  { %s1292_s14 = scalar_lea.hbm %s1601_s5, 32 }
0x16bf   :  { %p1293_p7 = scmp.ne.s32.totalorder %s1601_s5, %s1292_s14  ;;  %p1296_p8 = scmp.lt.u32.totalorder %s1292_s14, %s1601_s5 }
0x16c1   :  { %p1298_p9 = pnand %p1296_p8, %p1293_p7 }
0x16c3   :  { %1301 = shalt.err (!%p1298_p9)
}
0x16c4   :  { %950 = dma.vmem_to_hbm [thread:$0]  %s948_s28, 32, %s1601_s5, [#allocation11]  }
0x16c5   :  { %s1302_s0 = scalar_lea.vmem %s1540_s30, 256  ;;  %p1307_p11 = scmp.lt.s32.totalorder %s1540_s30, %s1540_s30 }
0x16c6   :  { %p1303_p10 = scmp.ne.s32.totalorder %s1540_s30, %s1302_s0  ;;  %p1308_p12 = scmp.lt.s32.totalorder %s1302_s0, %s1302_s0 }
0x16c8   :  { %p1309_p13 = por %p1308_p12, %p1307_p11 }
0x16ca   :  { %p1310_p0 = pnand %p1309_p13, %p1303_p10 }
0x16cc   :  { %1313 = shalt.err (!%p1310_p0)
}
0x16cd   :  { %s1314_s23 = scalar_lea.hbm %s1600_s4, 256 }
0x16ce   :  { %p1315_p1 = scmp.ne.s32.totalorder %s1600_s4, %s1314_s23  ;;  %p1318_p2 = scmp.lt.u32.totalorder %s1314_s23, %s1600_s4 }
0x16d0   :  { %p1320_p3 = pnand %p1318_p2, %p1315_p1 }
0x16d2   :  { %1323 = shalt.err (!%p1320_p3)
}
0x16d3   :  { %940 = dma.vmem_to_hbm [thread:$0]  %s1540_s30, 256, %s1600_s4, [#allocation6], %s1355_s7, %s1355_s7, %s1356_s8  }
0x16d4   :  { %s1324_s3 = scalar_lea.vmem %s1545_s10, 32  ;;  %p1329_p5 = scmp.lt.s32.totalorder %s1545_s10, %s1545_s10 }
0x16d5   :  { %p1325_p4 = scmp.ne.s32.totalorder %s1545_s10, %s1324_s3  ;;  %p1330_p6 = scmp.lt.s32.totalorder %s1324_s3, %s1324_s3 }
0x16d7   :  { %p1331_p7 = por %p1330_p6, %p1329_p5 }
0x16d9   :  { %p1332_p8 = pnand %p1331_p7, %p1325_p4 }
0x16db   :  { %1335 = shalt.err (!%p1332_p8)
}
0x16dc   :  { %s1336_s29 = scalar_lea.hbm %s1602_s6, 32 }
0x16dd   :  { %p1337_p9 = scmp.ne.s32.totalorder %s1602_s6, %s1336_s29  ;;  %p1340_p10 = scmp.lt.u32.totalorder %s1336_s29, %s1602_s6 }
0x16df   :  { %p1342_p11 = pnand %p1340_p10, %p1337_p9 }
0x16e1   :  { %1345 = shalt.err (!%p1342_p11)
}
0x16e2   :  { %960 = dma.vmem_to_hbm [thread:$0]  %s1545_s10, 32, %s1602_s6, [#allocation11]  }
0x16e3   :  { %1350 = dma.done.wait [#allocation6], 256  }
0x16e4   :  { %1351 = vsyncadd [#allocation6], 4294967040 }
0x16e5   :  { %1352 = dma.done.wait [#allocation11], 64  }
0x16e6   :  { %1353 = vsyncadd [#allocation11], 4294967232 }
0x16e7   :  { %970 = vsyncpa [#allocation5], 1 }
0x16e8   :  { %971 = vsyncpa [#allocation8], 1 }
0x16e9   :  { %972 = vsyncpa [#allocation6], 1 }
0x16ea   :  { %973 = vsyncpa [#allocation11], 1 }

</bundles_post_ra>
